<compile_context>
chip_gen: v5e
topology: v5e:2x2
jax: 0.10.0
libtpu: 0.0.40
codegen_flags: <defaults>
</compile_context>

<pallas_src>
import jax
import jax.numpy as jnp
from jax.experimental import pallas as pl
from jax.experimental.pallas import tpu as pltpu

LANE = 128
SUBLANE = 8


def _round_up(n, m):
    return ((n + m - 1) // m) * m


# ----------------------------------------------------------------------------
# Kernel
# ----------------------------------------------------------------------------
def discriminator_kernel(x_ref,
                         w1_ref, b1_ref,
                         w2_ref, b2_ref,
                         w3_ref, b3_ref,
                         w4_ref, b4_ref,
                         o_ref):
    def linear(h, w_ref, b_ref):
        # bf16 weights cast up once per (VMEM-resident) tile; f32 matmul + f32 bias.
        w = w_ref[...].astype(jnp.float32)
        return jnp.dot(h, w, preferred_element_type=jnp.float32) + b_ref[...]

    def leaky(h):
        # Equivalent to LeakyReLU(0.2) since 0.2 > 0; single VPU max op.
        return jnp.maximum(h, 0.2 * h)

    x = x_ref[...].astype(jnp.float32)
    h = leaky(linear(x, w1_ref, b1_ref))
    h = leaky(linear(h, w2_ref, b2_ref))
    h = leaky(linear(h, w3_ref, b3_ref))
    z = linear(h, w4_ref, b4_ref)

    # sigmoid(z) = 1 / (1 + exp(-z)); exp and approx-reciprocal both ride the EUP.
    o_ref[...] = pl.reciprocal(1.0 + jnp.exp(-z), approx=True).astype(o_ref.dtype)


# ----------------------------------------------------------------------------
# Parameter preparation (call ONCE, outside the forward path)
# ----------------------------------------------------------------------------
def prepare_params(params, *, weight_dtype=jnp.bfloat16):
    """Pad/cast weights for the kernel.

    - Layer-1 input dim is left UNPADDED (K=16 handled by the MXU directly).
    - Hidden dim padded to 128 lanes (bf16, VMEM-resident, loaded once).
    - Final output dim padded only to a multiple of 8 (keeps the HBM write tiny).
    - Biases stay float32.
    """
    d_in, hid = params["w1"].shape
    out_dim = params["w4"].shape[1]
    hid_p = _round_up(hid, LANE)
    out_p = _round_up(out_dim, SUBLANE)

    padded_shapes = [(d_in, hid_p), (hid_p, hid_p), (hid_p, hid_p), (hid_p, out_p)]
    prepared = {}
    for i, (fi_p, fo_p) in enumerate(padded_shapes, start=1):
        w = params[f"w{i}"].astype(jnp.float32)
        b = params[f"b{i}"].astype(jnp.float32).reshape(1, -1)
        fi, fo = w.shape
        wp = jnp.zeros((fi_p, fo_p), weight_dtype).at[:fi, :fo].set(
            w.astype(weight_dtype))
        bp = jnp.zeros((1, fo_p), jnp.float32).at[:, :fo].set(b)
        prepared[f"w{i}"] = wp
        prepared[f"b{i}"] = bp
    return prepared


# ----------------------------------------------------------------------------
# Forward wrapper
# ----------------------------------------------------------------------------
def discriminator_forward(x, prepared, *, out_dim=1, tm=512):
    """x: (B, input_dim) float32.  `prepared` comes from prepare_params()."""
    B, d_in = x.shape
    assert prepared["w1"].shape[0] == d_in, "input dim mismatch with prepared params"
    out_p = prepared["w4"].shape[1]

    # Batch tile: multiple of the sublane (8), capped at `tm` (default 512 rows —
    # big enough that the ~0.35 us/step grid overhead is amortised).
    b_tile = max(SUBLANE, min(_round_up(tm, SUBLANE), _round_up(B, SUBLANE)))
    b_pad = _round_up(B, b_tile)

    x_p = x.astype(jnp.float32)
    if b_pad != B:
        x_p = jnp.zeros((b_pad, d_in), jnp.float32).at[:B].set(x_p)

    grid = (b_pad // b_tile,)

    def resident(shape):
        # Same block for every grid step -> fetched once, stays VMEM-resident.
        return pl.BlockSpec(shape, lambda i: (0, 0))

    in_specs = [pl.BlockSpec((b_tile, d_in), lambda i: (i, 0))]
    for j in range(1, 5):
        in_specs.append(resident(prepared[f"w{j}"].shape))
        in_specs.append(resident(prepared[f"b{j}"].shape))

    out_padded = pl.pallas_call(
        discriminator_kernel,
        out_shape=jax.ShapeDtypeStruct((b_pad, out_p), jnp.float32),
        grid=grid,
        in_specs=in_specs,
        out_specs=pl.BlockSpec((b_tile, out_p), lambda i: (i, 0)),
        compiler_params=pltpu.CompilerParams(
            dimension_semantics=("parallel",)),
    )(x_p,
      prepared["w1"], prepared["b1"],
      prepared["w2"], prepared["b2"],
      prepared["w3"], prepared["b3"],
      prepared["w4"], prepared["b4"])

    return out_padded[:B, :out_dim]


# ----------------------------------------------------------------------------
# Params / reference
# ----------------------------------------------------------------------------
def init_params(key, input_dim, hidden_dim, output_dim):
    """Deterministic synthetic init (PyTorch-style U(-1/sqrt(fan_in), 1/sqrt(fan_in)))."""
    dims = [(input_dim, hidden_dim),
            (hidden_dim, hidden_dim),
            (hidden_dim, hidden_dim),
            (hidden_dim, output_dim)]
    params = {}
    keys = jax.random.split(key, 2 * len(dims))
    for i, (fan_in, fan_out) in enumerate(dims):
        bound = 1.0 / jnp.sqrt(jnp.float32(fan_in))
        w = jax.random.uniform(keys[2 * i], (fan_in, fan_out),
                               minval=-bound, maxval=bound, dtype=jnp.float32)
        b = jax.random.uniform(keys[2 * i + 1], (1, fan_out),
                               minval=-bound, maxval=bound, dtype=jnp.float32)
        params[f"w{i + 1}"] = w
        params[f"b{i + 1}"] = b
    return params


def reference_forward(x, params):
    h = x
    for i in range(1, 4):
        h = jnp.dot(h, params[f"w{i}"]) + params[f"b{i}"]
        h = jnp.where(h >= 0, h, 0.2 * h)
    h = jnp.dot(h, params["w4"]) + params["b4"]
    return jax.nn.sigmoid(h)


if __name__ == "__main__":
    key = jax.random.PRNGKey(0)
    k_x, k_p = jax.random.split(key)

    batch = 200          # small, but > one tile so the tiled/parallel path is exercised
    input_dim = 16
    hidden_dim = 32
    output_dim = 1

    x = jax.random.normal(k_x, (batch, input_dim), dtype=jnp.float32)
    params = init_params(k_p, input_dim, hidden_dim, output_dim)

    # Parameter padding/casting hoisted out of the forward path (done once).
    prepared = prepare_params(params)

    # tm=128 -> 2 batch tiles (>=2 grid steps; exercises the parallel batch grid).
    out = discriminator_forward(x, prepared, out_dim=output_dim, tm=128)
    out = jax.block_until_ready(out)

    ref = reference_forward(x, params)
    assert out.shape == (batch, output_dim)
    # bf16 weights + approx reciprocal => small deviation from the f32 reference.
    assert jnp.allclose(out, ref, atol=1e-2, rtol=0.0), "mismatch vs reference"

    print("KERNEL_OK")
</pallas_src>

<mosaic_0001>
module attributes {stable_mosaic.version = 11 : i64} {
  func.func @discriminator_kernel(%arg0: i32, %arg1: memref<128x16xf32, #tpu.memory_space<vmem>>, %arg2: memref<16x128xbf16, #tpu.memory_space<vmem>>, %arg3: memref<1x128xf32, #tpu.memory_space<vmem>>, %arg4: memref<128x128xbf16, #tpu.memory_space<vmem>>, %arg5: memref<1x128xf32, #tpu.memory_space<vmem>>, %arg6: memref<128x128xbf16, #tpu.memory_space<vmem>>, %arg7: memref<1x128xf32, #tpu.memory_space<vmem>>, %arg8: memref<128x8xbf16, #tpu.memory_space<vmem>>, %arg9: memref<1x8xf32, #tpu.memory_space<vmem>>, %arg10: memref<128x8xf32, #tpu.memory_space<vmem>>) attributes {dimension_semantics = [#tpu.dimension_semantics<parallel>], iteration_bounds = array<i64: 2>, scalar_prefetch = 0 : i64, scratch_operands = 0 : i64, tpu.core_type = #tpu.core_type<tc>, window_params = [{transform_indices = @transform_0, window_bounds = array<i64: 128, 16>}, {pipeline_mode = #tpu.pipeline_mode<synchronous>, transform_indices = @transform_1, window_bounds = array<i64: 16, 128>}, {pipeline_mode = #tpu.pipeline_mode<synchronous>, transform_indices = @transform_2, window_bounds = array<i64: 1, 128>}, {pipeline_mode = #tpu.pipeline_mode<synchronous>, transform_indices = @transform_3, window_bounds = array<i64: 128, 128>}, {pipeline_mode = #tpu.pipeline_mode<synchronous>, transform_indices = @transform_4, window_bounds = array<i64: 1, 128>}, {pipeline_mode = #tpu.pipeline_mode<synchronous>, transform_indices = @transform_5, window_bounds = array<i64: 128, 128>}, {pipeline_mode = #tpu.pipeline_mode<synchronous>, transform_indices = @transform_6, window_bounds = array<i64: 1, 128>}, {pipeline_mode = #tpu.pipeline_mode<synchronous>, transform_indices = @transform_7, window_bounds = array<i64: 128, 8>}, {pipeline_mode = #tpu.pipeline_mode<synchronous>, transform_indices = @transform_8, window_bounds = array<i64: 1, 8>}, {transform_indices = @transform_9, window_bounds = array<i64: 128, 8>}]} {
    %c0 = arith.constant 0 : index
    %c0_0 = arith.constant 0 : index
    %0 = vector.load %arg1[%c0, %c0_0] : memref<128x16xf32, #tpu.memory_space<vmem>>, vector<128x16xf32>
    %c0_1 = arith.constant 0 : index
    %c0_2 = arith.constant 0 : index
    %1 = vector.load %arg2[%c0_1, %c0_2] : memref<16x128xbf16, #tpu.memory_space<vmem>>, vector<16x128xbf16>
    %2 = arith.extf %1 : vector<16x128xbf16> to vector<16x128xf32>
    %cst = arith.constant dense<0.000000e+00> : vector<128x128xf32>
    %3 = tpu.matmul %0, %2, %cst {dimension_numbers = #tpu.dot_dimension_numbers<[1], [0], [0], [1], [0, 0, 1, 1], [], []>} : vector<128x16xf32>, vector<16x128xf32>, vector<128x128xf32> -> vector<128x128xf32>
    %c0_3 = arith.constant 0 : index
    %c0_4 = arith.constant 0 : index
    %4 = vector.load %arg3[%c0_3, %c0_4] : memref<1x128xf32, #tpu.memory_space<vmem>>, vector<1x128xf32>
    %5 = vector.broadcast %4 : vector<1x128xf32> to vector<128x128xf32>
    %6 = arith.addf %3, %5 : vector<128x128xf32>
    %cst_5 = arith.constant 2.000000e-01 : f32
    %7 = vector.broadcast %cst_5 : f32 to vector<128x128xf32>
    %8 = arith.mulf %7, %6 : vector<128x128xf32>
    %9 = arith.maximumf %6, %8 : vector<128x128xf32>
    %c0_6 = arith.constant 0 : index
    %c0_7 = arith.constant 0 : index
    %10 = vector.load %arg4[%c0_6, %c0_7] : memref<128x128xbf16, #tpu.memory_space<vmem>>, vector<128x128xbf16>
    %11 = arith.extf %10 : vector<128x128xbf16> to vector<128x128xf32>
    %cst_8 = arith.constant dense<0.000000e+00> : vector<128x128xf32>
    %12 = tpu.matmul %9, %11, %cst_8 {dimension_numbers = #tpu.dot_dimension_numbers<[1], [0], [0], [1], [0, 0, 1, 1], [], []>} : vector<128x128xf32>, vector<128x128xf32>, vector<128x128xf32> -> vector<128x128xf32>
    %c0_9 = arith.constant 0 : index
    %c0_10 = arith.constant 0 : index
    %13 = vector.load %arg5[%c0_9, %c0_10] : memref<1x128xf32, #tpu.memory_space<vmem>>, vector<1x128xf32>
    %14 = vector.broadcast %13 : vector<1x128xf32> to vector<128x128xf32>
    %15 = arith.addf %12, %14 : vector<128x128xf32>
    %cst_11 = arith.constant 2.000000e-01 : f32
    %16 = vector.broadcast %cst_11 : f32 to vector<128x128xf32>
    %17 = arith.mulf %16, %15 : vector<128x128xf32>
    %18 = arith.maximumf %15, %17 : vector<128x128xf32>
    %c0_12 = arith.constant 0 : index
    %c0_13 = arith.constant 0 : index
    %19 = vector.load %arg6[%c0_12, %c0_13] : memref<128x128xbf16, #tpu.memory_space<vmem>>, vector<128x128xbf16>
    %20 = arith.extf %19 : vector<128x128xbf16> to vector<128x128xf32>
    %cst_14 = arith.constant dense<0.000000e+00> : vector<128x128xf32>
    %21 = tpu.matmul %18, %20, %cst_14 {dimension_numbers = #tpu.dot_dimension_numbers<[1], [0], [0], [1], [0, 0, 1, 1], [], []>} : vector<128x128xf32>, vector<128x128xf32>, vector<128x128xf32> -> vector<128x128xf32>
    %c0_15 = arith.constant 0 : index
    %c0_16 = arith.constant 0 : index
    %22 = vector.load %arg7[%c0_15, %c0_16] : memref<1x128xf32, #tpu.memory_space<vmem>>, vector<1x128xf32>
    %23 = vector.broadcast %22 : vector<1x128xf32> to vector<128x128xf32>
    %24 = arith.addf %21, %23 : vector<128x128xf32>
    %cst_17 = arith.constant 2.000000e-01 : f32
    %25 = vector.broadcast %cst_17 : f32 to vector<128x128xf32>
    %26 = arith.mulf %25, %24 : vector<128x128xf32>
    %27 = arith.maximumf %24, %26 : vector<128x128xf32>
    %c0_18 = arith.constant 0 : index
    %c0_19 = arith.constant 0 : index
    %28 = vector.load %arg8[%c0_18, %c0_19] : memref<128x8xbf16, #tpu.memory_space<vmem>>, vector<128x8xbf16>
    %29 = arith.extf %28 : vector<128x8xbf16> to vector<128x8xf32>
    %cst_20 = arith.constant dense<0.000000e+00> : vector<128x8xf32>
    %30 = tpu.matmul %27, %29, %cst_20 {dimension_numbers = #tpu.dot_dimension_numbers<[1], [0], [0], [1], [0, 0, 1, 1], [], []>} : vector<128x128xf32>, vector<128x8xf32>, vector<128x8xf32> -> vector<128x8xf32>
    %c0_21 = arith.constant 0 : index
    %c0_22 = arith.constant 0 : index
    %31 = vector.load %arg9[%c0_21, %c0_22] : memref<1x8xf32, #tpu.memory_space<vmem>>, vector<1x8xf32>
    %32 = vector.broadcast %31 : vector<1x8xf32> to vector<128x8xf32>
    %33 = arith.addf %30, %32 : vector<128x8xf32>
    %cst_23 = arith.constant 0.000000e+00 : f32
    %34 = vector.broadcast %cst_23 : f32 to vector<128x8xf32>
    %35 = arith.subf %34, %33 : vector<128x8xf32>
    %36 = math.exp %35 : vector<128x8xf32>
    %cst_24 = arith.constant 1.000000e+00 : f32
    %37 = vector.broadcast %cst_24 : f32 to vector<128x8xf32>
    %38 = arith.addf %37, %36 : vector<128x8xf32>
    %39 = tpu.reciprocal %38 {approx = true} : vector<128x8xf32> -> vector<128x8xf32>
    %c0_25 = arith.constant 0 : index
    %c0_26 = arith.constant 0 : index
    %40 = vector.load %arg10[%c0_25, %c0_26] : memref<128x8xf32, #tpu.memory_space<vmem>>, vector<128x8xf32>
    tpu.vector_store %arg10[%c0_25, %c0_26], %39 {strides = array<i32>} : memref<128x8xf32, #tpu.memory_space<vmem>>, vector<128x8xf32>,
    return
  }
  func.func @transform_0(%arg0: i32) -> (i32, i32) {
    %c0_i32 = arith.constant 0 : i32
    %c0_i32_0 = arith.constant 0 : i32
    return %arg0, %c0_i32 : i32, i32
  }
  func.func @transform_1(%arg0: i32) -> (i32, i32) {
    %c0_i32 = arith.constant 0 : i32
    %c0_i32_0 = arith.constant 0 : i32
    %c0_i32_1 = arith.constant 0 : i32
    return %c0_i32, %c0_i32_0 : i32, i32
  }
  func.func @transform_2(%arg0: i32) -> (i32, i32) {
    %c0_i32 = arith.constant 0 : i32
    %c0_i32_0 = arith.constant 0 : i32
    %c0_i32_1 = arith.constant 0 : i32
    return %c0_i32, %c0_i32_0 : i32, i32
  }
  func.func @transform_3(%arg0: i32) -> (i32, i32) {
    %c0_i32 = arith.constant 0 : i32
    %c0_i32_0 = arith.constant 0 : i32
    %c0_i32_1 = arith.constant 0 : i32
    return %c0_i32, %c0_i32_0 : i32, i32
  }
  func.func @transform_4(%arg0: i32) -> (i32, i32) {
    %c0_i32 = arith.constant 0 : i32
    %c0_i32_0 = arith.constant 0 : i32
    %c0_i32_1 = arith.constant 0 : i32
    return %c0_i32, %c0_i32_0 : i32, i32
  }
  func.func @transform_5(%arg0: i32) -> (i32, i32) {
    %c0_i32 = arith.constant 0 : i32
    %c0_i32_0 = arith.constant 0 : i32
    %c0_i32_1 = arith.constant 0 : i32
    return %c0_i32, %c0_i32_0 : i32, i32
  }
  func.func @transform_6(%arg0: i32) -> (i32, i32) {
    %c0_i32 = arith.constant 0 : i32
    %c0_i32_0 = arith.constant 0 : i32
    %c0_i32_1 = arith.constant 0 : i32
    return %c0_i32, %c0_i32_0 : i32, i32
  }
  func.func @transform_7(%arg0: i32) -> (i32, i32) {
    %c0_i32 = arith.constant 0 : i32
    %c0_i32_0 = arith.constant 0 : i32
    %c0_i32_1 = arith.constant 0 : i32
    return %c0_i32, %c0_i32_0 : i32, i32
  }
  func.func @transform_8(%arg0: i32) -> (i32, i32) {
    %c0_i32 = arith.constant 0 : i32
    %c0_i32_0 = arith.constant 0 : i32
    %c0_i32_1 = arith.constant 0 : i32
    return %c0_i32, %c0_i32_0 : i32, i32
  }
  func.func @transform_9(%arg0: i32) -> (i32, i32) {
    %c0_i32 = arith.constant 0 : i32
    %c0_i32_0 = arith.constant 0 : i32
    return %arg0, %c0_i32 : i32, i32
  }
}

</mosaic_0001>

<bundles_post_ra>
// kernel: tpu_custom_call.1
= control target key start
LH: loop header
LB: loop body
LE: loop exit
PB: predicated region body
PF: predicated region fallthrough
CT: control target
= control target key end

     0   :  { %s1308_s30 = smov 0   ;;  %s1559_s0 = inlined_call_operand.vmem [shape: f32[256,16], index: 0, kind: input, shape index: {}]   ;;  %s1560_s1 = inlined_call_operand.vmem [shape: bf16[16,128], index: 1, kind: input, shape index: {}]   ;;  %s1561_s2 = inlined_call_operand.vmem [shape: f32[1,128], index: 2, kind: input, shape index: {}]   ;;  %s1562_s3 = inlined_call_operand.vmem [shape: bf16[128,128], index: 3, kind: input, shape index: {}]   ;;  %s1563_s4 = inlined_call_operand.vmem [shape: f32[1,128], index: 4, kind: input, shape index: {}]   ;;  %s1564_s5 = inlined_call_operand.vmem [shape: bf16[128,128], index: 5, kind: input, shape index: {}]   ;;  %s1565_s6 = inlined_call_operand.vmem [shape: f32[1,128], index: 6, kind: input, shape index: {}]   ;;  %s1566_s7 = inlined_call_operand.vmem [shape: bf16[128,8], index: 7, kind: input, shape index: {}]   ;;  %s1567_s8 = inlined_call_operand.vmem [shape: f32[1,8], index: 8, kind: input, shape index: {}]   ;;  %s1568_s9 = inlined_call_operand.vmem [shape: f32[256,8], index: 9, kind: output, shape index: {}]  }
   0x1 LB: > { %s1026_s10 = sadd.s32 4294967295, %s1256_s30   ;;  %p1030_p0 = scmp.ge.s32.totalorder %s1256_s30, 1  ;;  %s1256_s30 = sphi %s1308_s30, %s19_s30  }
   0x2   : > { %p288_p1 = scmp.lt.s32.totalorder %s1256_s30, 3 }
   0x4   : > { %p289_p2 = pnand %p1030_p0, %p288_p1 }
   0x5   : > { %s1031_s13 = sshll.u32 (!%p289_p2), %s1026_s10, 4 }
   0x6   : > { %292 = sbr.rel (%p289_p2) target bundleno = 694 (0x2b6), region = 56  ;;  %p325_p3 = scmp.lt.s32.totalorder (!%p289_p2), %s1031_s13, 31 }
   0xb   : > { %v1054_v0 = vld [vmem:[%s1560_s1] sm:$0xff]   ;;  %s1570_s13 = smov (!%p325_p3, %s1031_s13), 31  ;;  %vm360_vm0 = vcmask 130048   ;;  %v1159_v12 = vld [vmem:[%s1562_s3 + $0x38] sm:$0xff]   ;;  %v1158_v16 = vld [vmem:[%s1562_s3 + $0x30] sm:$0xff]   ;;  %vm953_vm1 = vcmask 64512  }
   0xc   : > { %v1056_v1 = vunpack.c.h.bf16 %v1054_v0  ;;  %v1055_v2 = vunpack.c.l.bf16 %v1054_v0  ;;  %s1032_s14 = sshll.u32 %s1570_s13, 3  ;;  %v1088_v13 = vunpack.c.h.bf16 %v1159_v12  ;;  %v1087_v14 = vunpack.c.l.bf16 %v1159_v12  ;;  %v1157_v19 = vld [vmem:[%s1562_s3 + $0x28] sm:$0xff]   ;;  %v1156_v23 = vld [vmem:[%s1562_s3 + $0x20] sm:$0xff]   ;;  %v1155_v26 = vld [vmem:[%s1562_s3 + $0x18] sm:$0xff]  }
   0xd   : > { %s1327_s17 = scalar_lea.vmem %s1559_s0, %s1032_s14  ;;  %v1084_v17 = vunpack.c.h.bf16 %v1158_v16  ;;  %v1083_v18 = vunpack.c.l.bf16 %v1158_v16  ;;  %v1080_v20 = vunpack.c.h.bf16 %v1157_v19  ;;  %v1079_v21 = vunpack.c.l.bf16 %v1157_v19  ;;  %v1154_v30 = vld [vmem:[%s1562_s3 + $0x10] sm:$0xff]   ;;  %v1153_v33 = vld [vmem:[%s1562_s3 + $0x8] sm:$0xff]   ;;  %v1058_v37 = vld [vmem:[%s1562_s3] sm:$0xff]   ;;  %s1509_s22 = scalar_lea.vmem %s1568_s9, %s1032_s14 }
   0xe   : > { %423 = vmatpush.msra.mxu0 %v1056_v1  ;;  %v336_v3 = vld [vmem:[%s1327_s17] sm:$0xff]  ;;  %v337_v4 = vld [vmem:[%s1327_s17 + $0x8] sm:$0xff]  ;;  %v338_v5 = vld [vmem:[%s1327_s17 + $0x10] sm:$0xff]  ;;  %542 = vmatpush.msra.mxu1 %v1088_v13  ;;  %v1076_v24 = vunpack.c.h.bf16 %v1156_v23  ;;  %v1075_v25 = vunpack.c.l.bf16 %v1156_v23  ;;  %v1072_v27 = vunpack.c.h.bf16 %v1155_v26  ;;  %v1071_v28 = vunpack.c.l.bf16 %v1155_v26 }
   0xf   : > { %v339_v6 = vld [vmem:[%s1327_s17 + $0x18] sm:$0xff]  ;;  %v340_v7 = vld [vmem:[%s1327_s17 + $0x20] sm:$0xff]  ;;  %v341_v8 = vld [vmem:[%s1327_s17 + $0x28] sm:$0xff]  ;;  %v1068_v31 = vunpack.c.h.bf16 %v1154_v30  ;;  %v1067_v32 = vunpack.c.l.bf16 %v1154_v30  ;;  %v1064_v34 = vunpack.c.h.bf16 %v1153_v33  ;;  %v1063_v36 = vunpack.c.l.bf16 %v1153_v33 }
  0x10   : > { %424 = vmatpush.msra.mxu0 %v1055_v2  ;;  %v342_v9 = vld [vmem:[%s1327_s17 + $0x30] sm:$0xff]  ;;  %v343_v10 = vld [vmem:[%s1327_s17 + $0x38] sm:$0xff]  ;;  %v344_v11 = vld [vmem:[%s1327_s17 + $0x40] sm:$0xff]  ;;  %543 = vmatpush.msra.mxu1 %v1087_v14  ;;  %v1060_v38 = vunpack.c.h.bf16 %v1058_v37  ;;  %v1059_v39 = vunpack.c.l.bf16 %v1058_v37 }
  0x11   : > { %1035 = vmatmul.msk.f32.vlgmr.msra.gmra.mxu0 %vm360_vm0, %v336_v3  ;;  %v345_v15 = vld [vmem:[%s1327_s17 + $0x48] sm:$0xff]  ;;  %v346_v22 = vld [vmem:[%s1327_s17 + $0x50] sm:$0xff]  ;;  %v347_v29 = vld [vmem:[%s1327_s17 + $0x58] sm:$0xff] }
  0x12   : > { %544 = vmatpush.msra.mxu1 %v1084_v17  ;;  %v348_v35 = vld [vmem:[%s1327_s17 + $0x60] sm:$0xff]  ;;  %v349_v40 = vld [vmem:[%s1327_s17 + $0x68] sm:$0xff]  ;;  %v350_v41 = vld [vmem:[%s1327_s17 + $0x70] sm:$0xff] }
  0x13   : > { %v351_v42 = vld [vmem:[%s1327_s17 + $0x78] sm:$0xff]  ;;  %v1388_v43 = vld [vmem:[%s1561_s2] ss:$0 sm:$0xff]  ;;  %v1165_v23 = vld [vmem:[%s1564_s5 + $0x30] sm:$0xff]  }
  0x14   : > { %545 = vmatpush.msra.mxu1 %v1083_v18  ;;  %v1166_v18 = vld [vmem:[%s1564_s5 + $0x38] sm:$0xff]   ;;  %v1115_v26 = vunpack.c.l.bf16 %v1165_v23  ;;  %v1163_v33 = vld [vmem:[%s1564_s5 + $0x20] sm:$0xff]  }
  0x15   : > { %v1120_v19 = vunpack.c.h.bf16 %v1166_v18 }
  0x16   : > { %546 = vmatpush.msra.mxu1 %v1080_v20 }
  0x17   : > { %675 = vmatpush.msra.mxu2 %v1120_v19 }
  0x18   : > { %547 = vmatpush.msra.mxu1 %v1079_v21  ;;  %v1119_v21 = vunpack.c.l.bf16 %v1166_v18 }
  0x19   : > { %1036 = vmatmul.msk.f32.gmra.mxu0 %vm360_vm0, %v337_v4 }
  0x1a   : > { %548 = vmatpush.msra.mxu1 %v1076_v24  ;;  %676 = vmatpush.msra.mxu2 %v1119_v21  ;;  %v1116_v24 = vunpack.c.h.bf16 %v1165_v23 }
  0x1c   : > { %549 = vmatpush.msra.mxu1 %v1075_v25  ;;  %677 = vmatpush.msra.mxu2 %v1116_v24 }
  0x1e   : > { %550 = vmatpush.msra.mxu1 %v1072_v27  ;;  %678 = vmatpush.msra.mxu2 %v1115_v26 }
  0x20   : > { %551 = vmatpush.msra.mxu1 %v1071_v28  ;;  %v1164_v28 = vld [vmem:[%s1564_s5 + $0x28] sm:$0xff]  }
  0x21   : > { %1037 = vmatmul.msk.f32.gmra.mxu0 %vm360_vm0, %v338_v5 }
  0x22   : > { %552 = vmatpush.msra.mxu1 %v1068_v31  ;;  %v1111_v31 = vunpack.c.l.bf16 %v1164_v28 }
  0x24   : > { %553 = vmatpush.msra.mxu1 %v1067_v32 }
  0x26   : > { %554 = vmatpush.msra.mxu1 %v1064_v34  ;;  %v1108_v34 = vunpack.c.h.bf16 %v1163_v33 }
  0x28   : > { %555 = vmatpush.msra.mxu1 %v1063_v36  ;;  %v1107_v36 = vunpack.c.l.bf16 %v1163_v33 }
  0x29   : > { %1038 = vmatmul.msk.f32.gmra.mxu0 %vm360_vm0, %v339_v6 }
  0x2a   : > { %556 = vmatpush.msra.mxu1 %v1060_v38  ;;  %v1162_v38 = vld [vmem:[%s1564_s5 + $0x18] sm:$0xff]  }
  0x2c   : > { %557 = vmatpush.msra.mxu1 %v1059_v39  ;;  %v1104_v39 = vunpack.c.h.bf16 %v1162_v38 }
  0x31   : > { %1039 = vmatmul.msk.f32.gmra.mxu0 %vm360_vm0, %v340_v7 }
  0x39   : > { %1040 = vmatmul.msk.f32.gmra.mxu0 %vm360_vm0, %v341_v8 }
  0x41   : > { %1041 = vmatmul.msk.f32.gmra.mxu0 %vm360_vm0, %v342_v9 }
  0x49   : > { %1042 = vmatmul.msk.f32.gmra.mxu0 %vm360_vm0, %v343_v10 }
  0x51   : > { %1043 = vmatmul.msk.f32.gmra.mxu0 %vm360_vm0, %v344_v11 }
  0x59   : > { %1044 = vmatmul.msk.f32.gmra.mxu0 %vm360_vm0, %v345_v15 }
  0x61   : > { %1045 = vmatmul.msk.f32.gmra.mxu0 %vm360_vm0, %v346_v22 }
  0x69   : > { %1046 = vmatmul.msk.f32.gmra.mxu0 %vm360_vm0, %v347_v29  ;;  %v1112_v29 = vunpack.c.h.bf16 %v1164_v28 }
  0x6b   : > { %679 = vmatpush.msra.mxu2 %v1112_v29 }
  0x6d   : > { %680 = vmatpush.msra.mxu2 %v1111_v31 }
  0x6f   : > { %681 = vmatpush.msra.mxu2 %v1108_v34 }
  0x71   : > { %1047 = vmatmul.msk.f32.gmra.mxu0 %vm360_vm0, %v348_v35  ;;  %682 = vmatpush.msra.mxu2 %v1107_v36 }
  0x73   : > { %683 = vmatpush.msra.mxu2 %v1104_v39 }
  0x79   : > { %1048 = vmatmul.msk.f32.gmra.mxu0 %vm360_vm0, %v349_v40 }
  0x81   : > { %1049 = vmatmul.msk.f32.gmra.mxu0 %vm360_vm0, %v350_v41  ;;  %v1103_v41 = vunpack.c.l.bf16 %v1162_v38 }
  0x83   : > { %684 = vmatpush.msra.mxu2 %v1103_v41 }
  0x89   : > { %1050 = vmatmul.msk.f32.gmra.mxu0 %vm360_vm0, %v351_v42 }
  0x8e   : > { %v426_v44 = vpop.f32.mrf.mxu0 }
  0x8f   : > { %v427_v45 = vadd.f32 %v1388_v43, %v426_v44  ;;  %v1161_v44 = vld [vmem:[%s1564_s5 + $0x10] sm:$0xff]  }
  0x91   : > { %v474_v46 = vmul.f32 0.2, %v427_v45 }
  0x93   : > { %v490_v47 = vmax.f32 %v427_v45, %v474_v46  ;;  %v1100_v45 = vunpack.c.h.bf16 %v1161_v44  ;;  %v1099_v46 = vunpack.c.l.bf16 %v1161_v44 }
  0x95   : > { %558 = vmatmul.f32.vlgmr.msra.gmra.mxu1 %v490_v47  ;;  %685 = vmatpush.msra.mxu2 %v1100_v45 }
  0x96   : > { %v429_v48 = vpop.f32.mrf.mxu0 }
  0x97   : > { %v430_v49 = vadd.f32 %v1388_v43, %v429_v48  ;;  %686 = vmatpush.msra.mxu2 %v1099_v46  ;;  %v1173_v46 = vld [vmem:[%s1566_s7 + $0x38] sm:$0xff]  }
  0x99   : > { %v475_v50 = vmul.f32 0.2, %v430_v49 }
  0x9b   : > { %v491_v51 = vmax.f32 %v430_v49, %v475_v50  ;;  %v1160_v49 = vld [vmem:[%s1564_s5 + $0x8] sm:$0xff]  }
  0x9c   : > { %v1096_v50 = vunpack.c.h.bf16 %v1160_v49 }
  0x9d   : > { %561 = vmatmul.f32.gmra.mxu1 %v491_v51 }
  0x9e   : > { %v432_v52 = vpop.f32.mrf.mxu0  ;;  %687 = vmatpush.msra.mxu2 %v1096_v50  ;;  %v1151_v50 = vunpack.c.l.bf16 %v1173_v46 }
  0x9f   : > { %v433_v53 = vadd.f32 %v1388_v43, %v432_v52  ;;  %v1095_v52 = vunpack.c.l.bf16 %v1160_v49 }
  0xa1   : > { %v476_v54 = vmul.f32 0.2, %v433_v53  ;;  %688 = vmatpush.msra.mxu2 %v1095_v52  ;;  %v1172_v52 = vld [vmem:[%s1566_s7 + $0x30] sm:$0xff]  }
  0xa3   : > { %v492_v55 = vmax.f32 %v433_v53, %v476_v54  ;;  %v1090_v54 = vld [vmem:[%s1564_s5] sm:$0xff]  }
  0xa5   : > { %564 = vmatmul.f32.gmra.mxu1 %v492_v55  ;;  %v1092_v55 = vunpack.c.h.bf16 %v1090_v54 }
  0xa6   : > { %v435_v56 = vpop.f32.mrf.mxu0 }
  0xa7   : > { %v436_v57 = vadd.f32 %v1388_v43, %v435_v56  ;;  %v1091_v56 = vunpack.c.l.bf16 %v1090_v54  ;;  %689 = vmatpush.msra.mxu2 %v1092_v55  ;;  %v1147_v55 = vunpack.c.l.bf16 %v1172_v52 }
  0xa9   : > { %v477_v58 = vmul.f32 0.2, %v436_v57  ;;  %690 = vmatpush.msra.mxu2 %v1091_v56  ;;  %v1171_v56 = vld [vmem:[%s1566_s7 + $0x28] sm:$0xff]  }
  0xab   : > { %v493_v59 = vmax.f32 %v436_v57, %v477_v58 }
  0xad   : > { %567 = vmatmul.f32.gmra.mxu1 %v493_v59 }
  0xae   : > { %v438_v60 = vpop.f32.mrf.mxu0 }
  0xaf   : > { %v439_v61 = vadd.f32 %v1388_v43, %v438_v60 }
  0xb1   : > { %v478_v62 = vmul.f32 0.2, %v439_v61 }
  0xb3   : > { %v494_v63 = vmax.f32 %v439_v61, %v478_v62 }
  0xb5   : > { %570 = vmatmul.f32.gmra.mxu1 %v494_v63 }
  0xb6   : > { %v441_v0 = vpop.f32.mrf.mxu0 }
  0xb7   : > { %v442_v1 = vadd.f32 %v1388_v43, %v441_v0 }
  0xb9   : > { %v479_v2 = vmul.f32 0.2, %v442_v1 }
  0xbb   : > { %v495_v3 = vmax.f32 %v442_v1, %v479_v2 }
  0xbd   : > { %573 = vmatmul.f32.gmra.mxu1 %v495_v3 }
  0xbe   : > { %v444_v4 = vpop.f32.mrf.mxu0 }
  0xbf   : > { %v445_v5 = vadd.f32 %v1388_v43, %v444_v4 }
  0xc1   : > { %v480_v6 = vmul.f32 0.2, %v445_v5 }
  0xc3   : > { %v496_v7 = vmax.f32 %v445_v5, %v480_v6  ;;  %v1433_v5 = vld [vmem:[%s1563_s4] ss:$0 sm:$0xff] }
  0xc5   : > { %576 = vmatmul.f32.gmra.mxu1 %v496_v7 }
  0xc6   : > { %v447_v8 = vpop.f32.mrf.mxu0 }
  0xc7   : > { %v448_v9 = vadd.f32 %v1388_v43, %v447_v8 }
  0xc9   : > { %v481_v10 = vmul.f32 0.2, %v448_v9 }
  0xcb   : > { %v497_v11 = vmax.f32 %v448_v9, %v481_v10 }
  0xcd   : > { %579 = vmatmul.f32.gmra.mxu1 %v497_v11 }
  0xce   : > { %v450_v12 = vpop.f32.mrf.mxu0 }
  0xcf   : > { %v451_v13 = vadd.f32 %v1388_v43, %v450_v12 }
  0xd1   : > { %v482_v14 = vmul.f32 0.2, %v451_v13 }
  0xd3   : > { %v498_v15 = vmax.f32 %v451_v13, %v482_v14 }
  0xd5   : > { %582 = vmatmul.f32.gmra.mxu1 %v498_v15 }
  0xd6   : > { %v453_v16 = vpop.f32.mrf.mxu0 }
  0xd7   : > { %v454_v17 = vadd.f32 %v1388_v43, %v453_v16 }
  0xd9   : > { %v483_v20 = vmul.f32 0.2, %v454_v17 }
  0xdb   : > { %v499_v22 = vmax.f32 %v454_v17, %v483_v20 }
  0xdd   : > { %585 = vmatmul.f32.gmra.mxu1 %v499_v22 }
  0xde   : > { %v456_v25 = vpop.f32.mrf.mxu0 }
  0xdf   : > { %v457_v27 = vadd.f32 %v1388_v43, %v456_v25 }
  0xe1   : > { %v484_v30 = vmul.f32 0.2, %v457_v27 }
  0xe3   : > { %v500_v32 = vmax.f32 %v457_v27, %v484_v30 }
  0xe5   : > { %588 = vmatmul.f32.gmra.mxu1 %v500_v32 }
  0xe6   : > { %v459_v35 = vpop.f32.mrf.mxu0 }
  0xe7   : > { %v460_v37 = vadd.f32 %v1388_v43, %v459_v35 }
  0xe9   : > { %v485_v40 = vmul.f32 0.2, %v460_v37 }
  0xeb   : > { %v501_v42 = vmax.f32 %v460_v37, %v485_v40 }
  0xed   : > { %591 = vmatmul.f32.gmra.mxu1 %v501_v42 }
  0xee   : > { %v462_v47 = vpop.f32.mrf.mxu0 }
  0xef   : > { %v463_v48 = vadd.f32 %v1388_v43, %v462_v47 }
  0xf1   : > { %v486_v51 = vmul.f32 0.2, %v463_v48 }
  0xf3   : > { %v502_v53 = vmax.f32 %v463_v48, %v486_v51  ;;  %v1152_v48 = vunpack.c.h.bf16 %v1173_v46 }
  0xf5   : > { %594 = vmatmul.f32.gmra.mxu1 %v502_v53  ;;  %808 = vmatpush.msra.mxu3 %v1152_v48  ;;  %v1148_v53 = vunpack.c.h.bf16 %v1172_v52 }
  0xf6   : > { %v465_v57 = vpop.f32.mrf.mxu0 }
  0xf7   : > { %v466_v58 = vadd.f32 %v1388_v43, %v465_v57  ;;  %809 = vmatpush.msra.mxu3 %v1151_v50 }
  0xf9   : > { %v487_v59 = vmul.f32 0.2, %v466_v58  ;;  %810 = vmatpush.msra.mxu3 %v1148_v53 }
  0xfb   : > { %v503_v60 = vmax.f32 %v466_v58, %v487_v59  ;;  %811 = vmatpush.msra.mxu3 %v1147_v55  ;;  %v1144_v58 = vunpack.c.h.bf16 %v1171_v56 }
  0xfd   : > { %597 = vmatmul.f32.gmra.mxu1 %v503_v60  ;;  %812 = vmatpush.msra.mxu3 %v1144_v58  ;;  %v1143_v60 = vunpack.c.l.bf16 %v1171_v56 }
  0xfe   : > { %v468_v61 = vpop.f32.mrf.mxu0 }
  0xff   : > { %v469_v62 = vadd.f32 %v1388_v43, %v468_v61  ;;  %813 = vmatpush.msra.mxu3 %v1143_v60 }
 0x101   : > { %v488_v63 = vmul.f32 0.2, %v469_v62 }
 0x103   : > { %v504_v0 = vmax.f32 %v469_v62, %v488_v63  ;;  %v1170_v62 = vld [vmem:[%s1566_s7 + $0x20] sm:$0xff]  }
 0x104   : > { %v1140_v63 = vunpack.c.h.bf16 %v1170_v62 }
 0x105   : > { %600 = vmatmul.f32.gmra.mxu1 %v504_v0 }
 0x106   : > { %v471_v1 = vpop.f32.mrf.mxu0  ;;  %814 = vmatpush.msra.mxu3 %v1140_v63 }
 0x107   : > { %v472_v2 = vadd.f32 %v1388_v43, %v471_v1  ;;  %v1139_v1 = vunpack.c.l.bf16 %v1170_v62 }
 0x109   : > { %v489_v3 = vmul.f32 0.2, %v472_v2  ;;  %815 = vmatpush.msra.mxu3 %v1139_v1 }
 0x10b   : > { %v505_v4 = vmax.f32 %v472_v2, %v489_v3  ;;  %v1169_v2 = vld [vmem:[%s1566_s7 + $0x18] sm:$0xff]   ;;  %v1168_v3 = vld [vmem:[%s1566_s7 + $0x10] sm:$0xff]  }
 0x10d   : > { %603 = vmatmul.f32.gmra.mxu1 %v505_v4 }
 0x112   : > { %v559_v6 = vpop.f32.mrf.mxu1 }
 0x113   : > { %v560_v7 = vadd.f32 %v1433_v5, %v559_v6  ;;  %v1136_v6 = vunpack.c.h.bf16 %v1169_v2 }
 0x115   : > { %v607_v8 = vmul.f32 0.2, %v560_v7  ;;  %816 = vmatpush.msra.mxu3 %v1136_v6 }
 0x117   : > { %v623_v9 = vmax.f32 %v560_v7, %v607_v8  ;;  %v1135_v7 = vunpack.c.l.bf16 %v1169_v2 }
 0x119   : > { %691 = vmatmul.f32.vlgmr.msra.gmra.mxu2 %v623_v9  ;;  %v1132_v9 = vunpack.c.h.bf16 %v1168_v3  ;;  %817 = vmatpush.msra.mxu3 %v1135_v7 }
 0x11a   : > { %v562_v10 = vpop.f32.mrf.mxu1 }
 0x11b   : > { %v563_v11 = vadd.f32 %v1433_v5, %v562_v10  ;;  %818 = vmatpush.msra.mxu3 %v1132_v9 }
 0x11d   : > { %v608_v12 = vmul.f32 0.2, %v563_v11 }
 0x11f   : > { %v624_v13 = vmax.f32 %v563_v11, %v608_v12  ;;  %v1131_v11 = vunpack.c.l.bf16 %v1168_v3 }
 0x121   : > { %694 = vmatmul.f32.gmra.mxu2 %v624_v13  ;;  %v1167_v13 = vld [vmem:[%s1566_s7 + $0x8] sm:$0xff]   ;;  %819 = vmatpush.msra.mxu3 %v1131_v11 }
 0x122   : > { %v565_v43 = vpop.f32.mrf.mxu1 }
 0x123   : > { %v566_v14 = vadd.f32 %v1433_v5, %v565_v43 }
 0x125   : > { %v609_v15 = vmul.f32 0.2, %v566_v14 }
 0x127   : > { %v625_v16 = vmax.f32 %v566_v14, %v609_v15  ;;  %v1128_v14 = vunpack.c.h.bf16 %v1167_v13 }
 0x129   : > { %697 = vmatmul.f32.gmra.mxu2 %v625_v16  ;;  %820 = vmatpush.msra.mxu3 %v1128_v14  ;;  %v1127_v16 = vunpack.c.l.bf16 %v1167_v13 }
 0x12a   : > { %v568_v17 = vpop.f32.mrf.mxu1 }
 0x12b   : > { %v569_v18 = vadd.f32 %v1433_v5, %v568_v17  ;;  %821 = vmatpush.msra.mxu3 %v1127_v16 }
 0x12d   : > { %v610_v19 = vmul.f32 0.2, %v569_v18 }
 0x12f   : > { %v626_v20 = vmax.f32 %v569_v18, %v610_v19  ;;  %v1122_v18 = vld [vmem:[%s1566_s7] sm:$0xff]  }
 0x130   : > { %v1124_v19 = vunpack.c.h.bf16 %v1122_v18 }
 0x131   : > { %700 = vmatmul.f32.gmra.mxu2 %v626_v20 }
 0x132   : > { %v571_v21 = vpop.f32.mrf.mxu1  ;;  %822 = vmatpush.msra.mxu3 %v1124_v19 }
 0x133   : > { %v572_v22 = vadd.f32 %v1433_v5, %v571_v21  ;;  %v1123_v21 = vunpack.c.l.bf16 %v1122_v18 }
 0x135   : > { %v611_v23 = vmul.f32 0.2, %v572_v22  ;;  %823 = vmatpush.msra.mxu3 %v1123_v21 }
 0x137   : > { %v627_v24 = vmax.f32 %v572_v22, %v611_v23 }
 0x139   : > { %703 = vmatmul.f32.gmra.mxu2 %v627_v24 }
 0x13a   : > { %v574_v25 = vpop.f32.mrf.mxu1 }
 0x13b   : > { %v575_v26 = vadd.f32 %v1433_v5, %v574_v25 }
 0x13d   : > { %v612_v27 = vmul.f32 0.2, %v575_v26 }
 0x13f   : > { %v628_v28 = vmax.f32 %v575_v26, %v612_v27 }
 0x141   : > { %706 = vmatmul.f32.gmra.mxu2 %v628_v28 }
 0x142   : > { %v577_v29 = vpop.f32.mrf.mxu1 }
 0x143   : > { %v578_v30 = vadd.f32 %v1433_v5, %v577_v29 }
 0x145   : > { %v613_v31 = vmul.f32 0.2, %v578_v30 }
 0x147   : > { %v629_v32 = vmax.f32 %v578_v30, %v613_v31  ;;  %v1478_v30 = vld [vmem:[%s1565_s6] ss:$0 sm:$0xff] }
 0x149   : > { %709 = vmatmul.f32.gmra.mxu2 %v629_v32 }
 0x14a   : > { %v580_v33 = vpop.f32.mrf.mxu1 }
 0x14b   : > { %v581_v34 = vadd.f32 %v1433_v5, %v580_v33 }
 0x14d   : > { %v614_v35 = vmul.f32 0.2, %v581_v34 }
 0x14f   : > { %v630_v36 = vmax.f32 %v581_v34, %v614_v35 }
 0x151   : > { %712 = vmatmul.f32.gmra.mxu2 %v630_v36 }
 0x152   : > { %v583_v37 = vpop.f32.mrf.mxu1 }
 0x153   : > { %v584_v38 = vadd.f32 %v1433_v5, %v583_v37 }
 0x155   : > { %v615_v39 = vmul.f32 0.2, %v584_v38 }
 0x157   : > { %v631_v40 = vmax.f32 %v584_v38, %v615_v39 }
 0x159   : > { %715 = vmatmul.f32.gmra.mxu2 %v631_v40 }
 0x15a   : > { %v586_v41 = vpop.f32.mrf.mxu1 }
 0x15b   : > { %v587_v42 = vadd.f32 %v1433_v5, %v586_v41 }
 0x15d   : > { %v616_v44 = vmul.f32 0.2, %v587_v42 }
 0x15f   : > { %v632_v45 = vmax.f32 %v587_v42, %v616_v44 }
 0x161   : > { %718 = vmatmul.f32.gmra.mxu2 %v632_v45 }
 0x162   : > { %v589_v47 = vpop.f32.mrf.mxu1 }
 0x163   : > { %v590_v49 = vadd.f32 %v1433_v5, %v589_v47 }
 0x165   : > { %v617_v51 = vmul.f32 0.2, %v590_v49 }
 0x167   : > { %v633_v54 = vmax.f32 %v590_v49, %v617_v51 }
 0x169   : > { %721 = vmatmul.f32.gmra.mxu2 %v633_v54 }
 0x16a   : > { %v592_v57 = vpop.f32.mrf.mxu1 }
 0x16b   : > { %v593_v59 = vadd.f32 %v1433_v5, %v592_v57 }
 0x16d   : > { %v618_v61 = vmul.f32 0.2, %v593_v59 }
 0x16f   : > { %v634_v0 = vmax.f32 %v593_v59, %v618_v61 }
 0x171   : > { %724 = vmatmul.f32.gmra.mxu2 %v634_v0 }
 0x172   : > { %v595_v4 = vpop.f32.mrf.mxu1 }
 0x173   : > { %v596_v8 = vadd.f32 %v1433_v5, %v595_v4 }
 0x175   : > { %v619_v10 = vmul.f32 0.2, %v596_v8 }
 0x177   : > { %v635_v12 = vmax.f32 %v596_v8, %v619_v10 }
 0x179   : > { %727 = vmatmul.f32.gmra.mxu2 %v635_v12 }
 0x17a   : > { %v598_v43 = vpop.f32.mrf.mxu1 }
 0x17b   : > { %v599_v15 = vadd.f32 %v1433_v5, %v598_v43 }
 0x17d   : > { %v620_v17 = vmul.f32 0.2, %v599_v15 }
 0x17f   : > { %v636_v20 = vmax.f32 %v599_v15, %v620_v17 }
 0x181   : > { %730 = vmatmul.f32.gmra.mxu2 %v636_v20 }
 0x182   : > { %v601_v22 = vpop.f32.mrf.mxu1 }
 0x183   : > { %v602_v23 = vadd.f32 %v1433_v5, %v601_v22 }
 0x185   : > { %v621_v24 = vmul.f32 0.2, %v602_v23 }
 0x187   : > { %v637_v25 = vmax.f32 %v602_v23, %v621_v24 }
 0x189   : > { %733 = vmatmul.f32.gmra.mxu2 %v637_v25 }
 0x18a   : > { %v604_v26 = vpop.f32.mrf.mxu1 }
 0x18b   : > { %v605_v27 = vadd.f32 %v1433_v5, %v604_v26 }
 0x18d   : > { %v622_v28 = vmul.f32 0.2, %v605_v27 }
 0x18f   : > { %v638_v29 = vmax.f32 %v605_v27, %v622_v28 }
 0x191   : > { %736 = vmatmul.f32.gmra.mxu2 %v638_v29 }
 0x19c   : > { %v692_v31 = vpop.f32.mrf.mxu2 }
 0x19d   : > { %v693_v32 = vadd.f32 %v1478_v30, %v692_v31 }
 0x19f   : > { %v740_v33 = vmul.f32 0.2, %v693_v32 }
 0x1a1   : > { %v756_v34 = vmax.f32 %v693_v32, %v740_v33  ;;  %v1499_v32 = vld [vmem:[%s1567_s8] ss:$0 sm:$0xff] }
 0x1a3   : > { %824 = vmatmul.f32.vlgmr.msra.gmra.mxu3 %v756_v34 }
 0x1a4   : > { %v695_v35 = vpop.f32.mrf.mxu2 }
 0x1a5   : > { %v696_v36 = vadd.f32 %v1478_v30, %v695_v35 }
 0x1a7   : > { %v741_v37 = vmul.f32 0.2, %v696_v36 }
 0x1a9   : > { %v757_v38 = vmax.f32 %v696_v36, %v741_v37 }
 0x1ab   : > { %827 = vmatmul.f32.gmra.mxu3 %v757_v38 }
 0x1ac   : > { %v698_v5 = vpop.f32.mrf.mxu2 }
 0x1ad   : > { %v699_v39 = vadd.f32 %v1478_v30, %v698_v5 }
 0x1af   : > { %v742_v40 = vmul.f32 0.2, %v699_v39 }
 0x1b1   : > { %v758_v41 = vmax.f32 %v699_v39, %v742_v40 }
 0x1b3   : > { %830 = vmatmul.f32.gmra.mxu3 %v758_v41 }
 0x1b4   : > { %v701_v42 = vpop.f32.mrf.mxu2 }
 0x1b5   : > { %v702_v44 = vadd.f32 %v1478_v30, %v701_v42 }
 0x1b7   : > { %v743_v45 = vmul.f32 0.2, %v702_v44 }
 0x1b9   : > { %v759_v46 = vmax.f32 %v702_v44, %v743_v45 }
 0x1bb   : > { %833 = vmatmul.f32.gmra.mxu3 %v759_v46 }
 0x1bc   : > { %v704_v47 = vpop.f32.mrf.mxu2 }
 0x1bd   : > { %v705_v48 = vadd.f32 %v1478_v30, %v704_v47 }
 0x1bf   : > { %v744_v49 = vmul.f32 0.2, %v705_v48 }
 0x1c1   : > { %v760_v50 = vmax.f32 %v705_v48, %v744_v49 }
 0x1c3   : > { %836 = vmatmul.f32.gmra.mxu3 %v760_v50 }
 0x1c4   : > { %v707_v51 = vpop.f32.mrf.mxu2 }
 0x1c5   : > { %v708_v52 = vadd.f32 %v1478_v30, %v707_v51 }
 0x1c7   : > { %v745_v53 = vmul.f32 0.2, %v708_v52 }
 0x1c9   : > { %v761_v54 = vmax.f32 %v708_v52, %v745_v53 }
 0x1cb   : > { %839 = vmatmul.f32.gmra.mxu3 %v761_v54 }
 0x1cc   : > { %v710_v55 = vpop.f32.mrf.mxu2 }
 0x1cd   : > { %v711_v56 = vadd.f32 %v1478_v30, %v710_v55 }
 0x1cf   : > { %v746_v57 = vmul.f32 0.2, %v711_v56 }
 0x1d1   : > { %v762_v58 = vmax.f32 %v711_v56, %v746_v57 }
 0x1d3   : > { %842 = vmatmul.f32.gmra.mxu3 %v762_v58 }
 0x1d4   : > { %v713_v59 = vpop.f32.mrf.mxu2 }
 0x1d5   : > { %v714_v60 = vadd.f32 %v1478_v30, %v713_v59 }
 0x1d7   : > { %v747_v61 = vmul.f32 0.2, %v714_v60 }
 0x1d9   : > { %v763_v62 = vmax.f32 %v714_v60, %v747_v61 }
 0x1db   : > { %845 = vmatmul.f32.gmra.mxu3 %v763_v62 }
 0x1dc   : > { %v716_v63 = vpop.f32.mrf.mxu2 }
 0x1dd   : > { %v717_v0 = vadd.f32 %v1478_v30, %v716_v63 }
 0x1df   : > { %v748_v1 = vmul.f32 0.2, %v717_v0 }
 0x1e1   : > { %v764_v2 = vmax.f32 %v717_v0, %v748_v1 }
 0x1e3   : > { %848 = vmatmul.f32.gmra.mxu3 %v764_v2 }
 0x1e4   : > { %v719_v3 = vpop.f32.mrf.mxu2 }
 0x1e5   : > { %v720_v4 = vadd.f32 %v1478_v30, %v719_v3 }
 0x1e7   : > { %v749_v6 = vmul.f32 0.2, %v720_v4 }
 0x1e9   : > { %v765_v7 = vmax.f32 %v720_v4, %v749_v6 }
 0x1eb   : > { %851 = vmatmul.f32.gmra.mxu3 %v765_v7 }
 0x1ec   : > { %v722_v8 = vpop.f32.mrf.mxu2 }
 0x1ed   : > { %v723_v9 = vadd.f32 %v1478_v30, %v722_v8 }
 0x1ef   : > { %v750_v10 = vmul.f32 0.2, %v723_v9 }
 0x1f1   : > { %v766_v11 = vmax.f32 %v723_v9, %v750_v10 }
 0x1f3   : > { %854 = vmatmul.f32.gmra.mxu3 %v766_v11 }
 0x1f4   : > { %v725_v12 = vpop.f32.mrf.mxu2 }
 0x1f5   : > { %v726_v13 = vadd.f32 %v1478_v30, %v725_v12 }
 0x1f7   : > { %v751_v43 = vmul.f32 0.2, %v726_v13 }
 0x1f9   : > { %v767_v14 = vmax.f32 %v726_v13, %v751_v43 }
 0x1fb   : > { %857 = vmatmul.f32.gmra.mxu3 %v767_v14 }
 0x1fc   : > { %v728_v15 = vpop.f32.mrf.mxu2 }
 0x1fd   : > { %v729_v16 = vadd.f32 %v1478_v30, %v728_v15 }
 0x1ff   : > { %v752_v17 = vmul.f32 0.2, %v729_v16 }
 0x201   : > { %v768_v18 = vmax.f32 %v729_v16, %v752_v17 }
 0x203   : > { %860 = vmatmul.f32.gmra.mxu3 %v768_v18 }
 0x204   : > { %v731_v19 = vpop.f32.mrf.mxu2 }
 0x205   : > { %v732_v20 = vadd.f32 %v1478_v30, %v731_v19 }
 0x207   : > { %v753_v21 = vmul.f32 0.2, %v732_v20 }
 0x209   : > { %v769_v22 = vmax.f32 %v732_v20, %v753_v21 }
 0x20b   : > { %863 = vmatmul.f32.gmra.mxu3 %v769_v22 }
 0x20c   : > { %v734_v23 = vpop.f32.mrf.mxu2 }
 0x20d   : > { %v735_v24 = vadd.f32 %v1478_v30, %v734_v23 }
 0x20f   : > { %v754_v25 = vmul.f32 0.2, %v735_v24 }
 0x211   : > { %v770_v26 = vmax.f32 %v735_v24, %v754_v25 }
 0x213   : > { %866 = vmatmul.f32.gmra.mxu3 %v770_v26 }
 0x214   : > { %v737_v27 = vpop.f32.mrf.mxu2 }
 0x215   : > { %v738_v28 = vadd.f32 %v1478_v30, %v737_v27 }
 0x217   : > { %v755_v29 = vmul.f32 0.2, %v738_v28 }
 0x219   : > { %v771_v31 = vmax.f32 %v738_v28, %v755_v29 }
 0x21b   : > { %869 = vmatmul.f32.gmra.mxu3 %v771_v31 }
 0x226   : > { %v825_v33 = vpop.f32.mrf.mxu3 }
 0x227   : > { %v826_v34 = vadd.f32 %v1499_v32, %v825_v33 }
 0x229   : > { %v873_v35 = vsub.f32 0.0, %v826_v34 }
 0x22b   : > { %v889_v36 = vmul.f32 1.442695, %v873_v35 }
 0x22d   : > { %1186 = vpow2.f32 %v889_v36 }
 0x22e   : > { %v828_v37 = vpop.f32.mrf.mxu3 }
 0x22f   : > { %v829_v38 = vadd.f32 %v1499_v32, %v828_v37 }
 0x231   : > { %v874_v5 = vsub.f32 0.0, %v829_v38 }
 0x233   : > { %v1187_v30 = vpop.eup %1186  ;;  %v891_v39 = vmul.f32 1.442695, %v874_v5 }
 0x234   : > { %v921_v40 = vadd.f32 1.0, %v1187_v30 }
 0x235   : > { %1188 = vpow2.f32 %v891_v39 }
 0x236   : > { %1190 = vrcp.f32 %v921_v40  ;;  %v831_v41 = vpop.f32.mrf.mxu3 }
 0x237   : > { %v832_v42 = vadd.f32 %v1499_v32, %v831_v41 }
 0x239   : > { %v875_v44 = vsub.f32 0.0, %v832_v42 }
 0x23b   : > { %v1189_v45 = vpop.eup %1188  ;;  %v893_v46 = vmul.f32 1.442695, %v875_v44 }
 0x23c   : > { %v1191_v47 = vpop.eup %1190  ;;  %v922_v48 = vadd.f32 1.0, %v1189_v45 }
 0x23d   : > { %954 = vst.msk [vmem:[%s1509_s22] sm:$0xff] %vm953_vm1, %v1191_v47  ;;  %1192 = vpow2.f32 %v893_v46 }
 0x23e   : > { %1194 = vrcp.f32 %v922_v48  ;;  %v834_v49 = vpop.f32.mrf.mxu3 }
 0x23f   : > { %v835_v50 = vadd.f32 %v1499_v32, %v834_v49 }
 0x241   : > { %v876_v51 = vsub.f32 0.0, %v835_v50 }
 0x243   : > { %v1193_v52 = vpop.eup %1192  ;;  %v895_v53 = vmul.f32 1.442695, %v876_v51 }
 0x244   : > { %v1195_v54 = vpop.eup %1194  ;;  %v923_v55 = vadd.f32 1.0, %v1193_v52 }
 0x245   : > { %955 = vst.msk [vmem:[%s1509_s22 + $0x8] sm:$0xff] %vm953_vm1, %v1195_v54  ;;  %1196 = vpow2.f32 %v895_v53 }
 0x246   : > { %1198 = vrcp.f32 %v923_v55  ;;  %v837_v56 = vpop.f32.mrf.mxu3 }
 0x247   : > { %v838_v57 = vadd.f32 %v1499_v32, %v837_v56 }
 0x249   : > { %v877_v58 = vsub.f32 0.0, %v838_v57 }
 0x24b   : > { %v1197_v59 = vpop.eup %1196  ;;  %v897_v60 = vmul.f32 1.442695, %v877_v58 }
 0x24c   : > { %v1199_v61 = vpop.eup %1198  ;;  %v924_v62 = vadd.f32 1.0, %v1197_v59 }
 0x24d   : > { %956 = vst.msk [vmem:[%s1509_s22 + $0x10] sm:$0xff] %vm953_vm1, %v1199_v61  ;;  %1200 = vpow2.f32 %v897_v60 }
 0x24e   : > { %1202 = vrcp.f32 %v924_v62  ;;  %v840_v63 = vpop.f32.mrf.mxu3 }
 0x24f   : > { %v841_v0 = vadd.f32 %v1499_v32, %v840_v63 }
 0x251   : > { %v878_v1 = vsub.f32 0.0, %v841_v0 }
 0x253   : > { %v1201_v2 = vpop.eup %1200  ;;  %v899_v3 = vmul.f32 1.442695, %v878_v1 }
 0x254   : > { %v1203_v4 = vpop.eup %1202  ;;  %v925_v6 = vadd.f32 1.0, %v1201_v2 }
 0x255   : > { %957 = vst.msk [vmem:[%s1509_s22 + $0x18] sm:$0xff] %vm953_vm1, %v1203_v4  ;;  %1204 = vpow2.f32 %v899_v3 }
 0x256   : > { %1206 = vrcp.f32 %v925_v6  ;;  %v843_v7 = vpop.f32.mrf.mxu3 }
 0x257   : > { %v844_v8 = vadd.f32 %v1499_v32, %v843_v7 }
 0x259   : > { %v879_v9 = vsub.f32 0.0, %v844_v8 }
 0x25b   : > { %v1205_v10 = vpop.eup %1204  ;;  %v901_v11 = vmul.f32 1.442695, %v879_v9 }
 0x25c   : > { %v1207_v12 = vpop.eup %1206  ;;  %v926_v13 = vadd.f32 1.0, %v1205_v10 }
 0x25d   : > { %958 = vst.msk [vmem:[%s1509_s22 + $0x20] sm:$0xff] %vm953_vm1, %v1207_v12  ;;  %1208 = vpow2.f32 %v901_v11 }
 0x25e   : > { %1210 = vrcp.f32 %v926_v13  ;;  %v846_v43 = vpop.f32.mrf.mxu3 }
 0x25f   : > { %v847_v14 = vadd.f32 %v1499_v32, %v846_v43 }
 0x261   : > { %v880_v15 = vsub.f32 0.0, %v847_v14 }
 0x263   : > { %v1209_v16 = vpop.eup %1208  ;;  %v903_v17 = vmul.f32 1.442695, %v880_v15 }
 0x264   : > { %v1211_v18 = vpop.eup %1210  ;;  %v927_v19 = vadd.f32 1.0, %v1209_v16 }
 0x265   : > { %959 = vst.msk [vmem:[%s1509_s22 + $0x28] sm:$0xff] %vm953_vm1, %v1211_v18  ;;  %1212 = vpow2.f32 %v903_v17 }
 0x266   : > { %1214 = vrcp.f32 %v927_v19  ;;  %v849_v20 = vpop.f32.mrf.mxu3 }
 0x267   : > { %v850_v21 = vadd.f32 %v1499_v32, %v849_v20 }
 0x269   : > { %v881_v22 = vsub.f32 0.0, %v850_v21 }
 0x26b   : > { %v1213_v23 = vpop.eup %1212  ;;  %v905_v24 = vmul.f32 1.442695, %v881_v22 }
 0x26c   : > { %v1215_v25 = vpop.eup %1214  ;;  %v928_v26 = vadd.f32 1.0, %v1213_v23 }
 0x26d   : > { %960 = vst.msk [vmem:[%s1509_s22 + $0x30] sm:$0xff] %vm953_vm1, %v1215_v25  ;;  %1216 = vpow2.f32 %v905_v24 }
 0x26e   : > { %1218 = vrcp.f32 %v928_v26  ;;  %v852_v27 = vpop.f32.mrf.mxu3 }
 0x26f   : > { %v853_v28 = vadd.f32 %v1499_v32, %v852_v27 }
 0x271   : > { %v882_v29 = vsub.f32 0.0, %v853_v28 }
 0x273   : > { %v1217_v31 = vpop.eup %1216  ;;  %v907_v33 = vmul.f32 1.442695, %v882_v29 }
 0x274   : > { %v1219_v34 = vpop.eup %1218  ;;  %v929_v35 = vadd.f32 1.0, %v1217_v31 }
 0x275   : > { %961 = vst.msk [vmem:[%s1509_s22 + $0x38] sm:$0xff] %vm953_vm1, %v1219_v34  ;;  %1220 = vpow2.f32 %v907_v33 }
 0x276   : > { %1222 = vrcp.f32 %v929_v35  ;;  %v855_v36 = vpop.f32.mrf.mxu3 }
 0x277   : > { %v856_v37 = vadd.f32 %v1499_v32, %v855_v36 }
 0x279   : > { %v883_v38 = vsub.f32 0.0, %v856_v37 }
 0x27b   : > { %v1221_v5 = vpop.eup %1220  ;;  %v909_v30 = vmul.f32 1.442695, %v883_v38 }
 0x27c   : > { %v1223_v39 = vpop.eup %1222  ;;  %v930_v40 = vadd.f32 1.0, %v1221_v5 }
 0x27d   : > { %962 = vst.msk [vmem:[%s1509_s22 + $0x40] sm:$0xff] %vm953_vm1, %v1223_v39  ;;  %1224 = vpow2.f32 %v909_v30 }
 0x27e   : > { %1226 = vrcp.f32 %v930_v40  ;;  %v858_v41 = vpop.f32.mrf.mxu3 }
 0x27f   : > { %v859_v42 = vadd.f32 %v1499_v32, %v858_v41 }
 0x281   : > { %v884_v44 = vsub.f32 0.0, %v859_v42 }
 0x283   : > { %v1225_v45 = vpop.eup %1224  ;;  %v911_v46 = vmul.f32 1.442695, %v884_v44 }
 0x284   : > { %v1227_v47 = vpop.eup %1226  ;;  %v931_v48 = vadd.f32 1.0, %v1225_v45 }
 0x285   : > { %963 = vst.msk [vmem:[%s1509_s22 + $0x48] sm:$0xff] %vm953_vm1, %v1227_v47  ;;  %1228 = vpow2.f32 %v911_v46 }
 0x286   : > { %1230 = vrcp.f32 %v931_v48  ;;  %v861_v49 = vpop.f32.mrf.mxu3 }
 0x287   : > { %v862_v50 = vadd.f32 %v1499_v32, %v861_v49 }
 0x289   : > { %v885_v51 = vsub.f32 0.0, %v862_v50 }
 0x28b   : > { %v1229_v52 = vpop.eup %1228  ;;  %v913_v53 = vmul.f32 1.442695, %v885_v51 }
 0x28c   : > { %v1231_v54 = vpop.eup %1230  ;;  %v932_v55 = vadd.f32 1.0, %v1229_v52 }
 0x28d   : > { %964 = vst.msk [vmem:[%s1509_s22 + $0x50] sm:$0xff] %vm953_vm1, %v1231_v54  ;;  %1232 = vpow2.f32 %v913_v53 }
 0x28e   : > { %1234 = vrcp.f32 %v932_v55  ;;  %v864_v56 = vpop.f32.mrf.mxu3 }
 0x28f   : > { %v865_v57 = vadd.f32 %v1499_v32, %v864_v56 }
 0x291   : > { %v886_v58 = vsub.f32 0.0, %v865_v57 }
 0x293   : > { %v1233_v59 = vpop.eup %1232  ;;  %v915_v60 = vmul.f32 1.442695, %v886_v58 }
 0x294   : > { %v1235_v61 = vpop.eup %1234  ;;  %v933_v62 = vadd.f32 1.0, %v1233_v59 }
 0x295   : > { %965 = vst.msk [vmem:[%s1509_s22 + $0x58] sm:$0xff] %vm953_vm1, %v1235_v61  ;;  %1236 = vpow2.f32 %v915_v60 }
 0x296   : > { %1238 = vrcp.f32 %v933_v62  ;;  %v867_v63 = vpop.f32.mrf.mxu3 }
 0x297   : > { %v868_v0 = vadd.f32 %v1499_v32, %v867_v63 }
 0x299   : > { %v887_v1 = vsub.f32 0.0, %v868_v0 }
 0x29b   : > { %v1237_v2 = vpop.eup %1236  ;;  %v917_v3 = vmul.f32 1.442695, %v887_v1 }
 0x29c   : > { %v1239_v4 = vpop.eup %1238  ;;  %v934_v6 = vadd.f32 1.0, %v1237_v2 }
 0x29d   : > { %966 = vst.msk [vmem:[%s1509_s22 + $0x60] sm:$0xff] %vm953_vm1, %v1239_v4  ;;  %1240 = vpow2.f32 %v917_v3 }
 0x29e   : > { %1242 = vrcp.f32 %v934_v6  ;;  %v870_v7 = vpop.f32.mrf.mxu3 }
 0x29f   : > { %v871_v8 = vadd.f32 %v1499_v32, %v870_v7 }
 0x2a1   : > { %v888_v9 = vsub.f32 0.0, %v871_v8 }
 0x2a3   : > { %v1241_v10 = vpop.eup %1240  ;;  %v919_v11 = vmul.f32 1.442695, %v888_v9 }
 0x2a4   : > { %v1243_v12 = vpop.eup %1242  ;;  %v935_v13 = vadd.f32 1.0, %v1241_v10 }
 0x2a5   : > { %967 = vst.msk [vmem:[%s1509_s22 + $0x68] sm:$0xff] %vm953_vm1, %v1243_v12  ;;  %1244 = vpow2.f32 %v919_v11 }
 0x2a6   : > { %1246 = vrcp.f32 %v935_v13 }
 0x2ab   : > { %v1245_v43 = vpop.eup %1244 }
 0x2ac   : > { %v1247_v14 = vpop.eup %1246  ;;  %v936_v15 = vadd.f32 1.0, %v1245_v43 }
 0x2ad   : > { %968 = vst.msk [vmem:[%s1509_s22 + $0x70] sm:$0xff] %vm953_vm1, %v1247_v14 }
 0x2ae   : > { %1248 = vrcp.f32 %v936_v15 }
 0x2b4   : > { %v1249_v16 = vpop.eup %1248 }
 0x2b5   : > { %969 = vst.msk [vmem:[%s1509_s22 + $0x78] sm:$0xff] %vm953_vm1, %v1249_v16 }
 0x2b6 PF: > { %s19_s30 = sadd.s32 1, %s1256_s30  }
 0x2b7   : > { %p16_p4 = scmp.ge.s32.totalorder %s19_s30, 4  }
 0x2b9   :  { %18 = sbr.rel (!%p16_p4) target bundleno = 1 (0x1), region = 86 }

</bundles_post_ra>
